<compile_context>
chip_gen: v7x
topology: tpu7x:2x2x1
jax: 0.10.0
libtpu: 0.0.40
codegen_flags: <defaults>
</compile_context>

<pallas_src>
import jax
import jax.numpy as jnp
from jax.experimental import pallas as pl
from jax.experimental.pallas import tpu as pltpu


def _vmem_capacity_bytes():
    """Per-core VMEM capacity; conservative (v7x) default if the query fails."""
    try:
        return int(pltpu.get_tpu_info().vmem_capacity_bytes)
    except Exception:
        return 64 * 1024 * 1024


# --------------------------------------------------------------------------- #
# Fused single-pass kernel: GAP + SE-MLP + weighted FMA, one batch per step.  #
# --------------------------------------------------------------------------- #
def _make_fused_kernel(n_scale):
    def kernel(*refs):
        # refs: w1 (S,fc,C4), b1 (1,C4), w2t (S,fc,C4), b2 (S,fc,1), sw (S,1,1),
        #       feat_0..feat_{S-1} each (fc,HW), out (fc,HW)
        w1_ref, b1_ref, w2t_ref, b2_ref, sw_ref = refs[:5]
        feat_refs = refs[5:5 + n_scale]
        o_ref = refs[5 + n_scale]

        # ---- GAP + first 1x1 conv (broadcast-mul + sublane reduce on VPU/XLU)
        h = b1_ref[...].astype(jnp.float32)                          # (1, C4)
        for s in range(n_scale):                                     # static unroll
            pooled_s = jnp.mean(feat_refs[s][...].astype(jnp.float32),
                                axis=-1, keepdims=True)              # (fc, 1)
            h = h + jnp.sum(w1_ref[s].astype(jnp.float32) * pooled_s,
                            axis=0, keepdims=True)                   # (1, C4)
        h = jax.nn.relu(h)

        # ---- second 1x1 conv + sigmoid; fold softmax(scale_w); weighted FMA --
        acc = None
        for s in range(n_scale):                                     # static unroll
            att_s = jax.nn.sigmoid(
                jnp.sum(w2t_ref[s].astype(jnp.float32) * h,
                        axis=-1, keepdims=True)
                + b2_ref[s].astype(jnp.float32))                     # (fc, 1)
            att_s = att_s * sw_ref[s]                                # * softmax(scale_w)[s]
            term = feat_refs[s][...].astype(jnp.float32) * att_s     # (fc, HW)
            acc = term if acc is None else acc + term
        o_ref[...] = acc.astype(o_ref.dtype)

    return kernel


# --------------------------------------------------------------------------- #
# Two-pass fallback streaming kernel: out_tile = sum_s att[s] * feat_s_tile.  #
# --------------------------------------------------------------------------- #
def _make_stream_kernel(n_scale):
    def kernel(att_ref, *refs):
        # att_ref        : (n_scale, feat_ch, 1) f32 — sigmoid(att) * softmax(scale_w)
        # refs[:n_scale] : (feat_ch, T) per-scale feature tiles (lane-dense spatial)
        # refs[n_scale]  : (feat_ch, T) output tile
        feat_refs = refs[:n_scale]
        o_ref = refs[n_scale]
        att = att_ref[...]                                  # single load, reused
        acc = feat_refs[0][...].astype(jnp.float32) * att[0]
        for s in range(1, n_scale):                         # static unroll
            acc = acc + feat_refs[s][...].astype(jnp.float32) * att[s]
        o_ref[...] = acc.astype(o_ref.dtype)

    return kernel


def _pick_spatial_tile(hw, feat_ch, n_scale, itemsize, budget_bytes, batch):
    """Spatial tile: multiple of 128, prefer exact divisor of hw, budget-bounded."""
    # Double-buffered (n_scale inputs + 1 output) tiles plus a live f32 accumulator.
    per_col = (n_scale + 1) * 2 * feat_ch * itemsize + 2 * feat_ch * 4
    t_budget = budget_bytes // max(per_col, 1)
    if t_budget >= hw or hw <= 128:
        return hw                                    # full extent (== array dim: OK)
    floor = min(hw, 512 if itemsize < 4 else 128)    # keep DMA rows long for bf16/i8
    t_max = max(floor, (min(t_budget, hw) // 128) * 128)
    chosen = t_max
    t = (t_max // 128) * 128
    while t >= floor:                                # prefer exact divisor: no ragged tail
        if hw % t == 0:
            chosen = t
            break
        t -= 128
    # Keep >= ~4 balanced grid steps so both v7x TensorCores stay busy.
    while batch * pl.cdiv(hw, chosen) < 4 and chosen >= 256 and chosen % 256 == 0:
        chosen //= 2
    return chosen


def safusion_forward(feats, params, *, force_two_pass=False):
    """feats: list of n_scale arrays, each (B, feat_ch, H, W) in torch NCHW layout.

    params: w1 (C, C4), b1 (C4,), w2 (C4, C), b2 (C,), scale_w (n_scale,).
    1x1 convs are stored as dense (in, out) matrices; channel order matches the
    torch.cat(feats, dim=1) ordering (scale-major), which is what w1/w2 expect.
    """
    n_scale = len(feats)
    B, feat_ch, H, W = feats[0].shape
    HW = H * W
    itemsize = feats[0].dtype.itemsize
    out_dtype = feats[0].dtype
    C4 = params["w1"].shape[1]
    C = n_scale * feat_ch

    capacity = _vmem_capacity_bytes()
    sw = jax.nn.softmax(params["scale_w"].astype(jnp.float32))        # (S,)
    feats_flat = [f.reshape(B, feat_ch, HW) for f in feats]           # free reshape

    # Fused-path VMEM footprint: double-buffered I/O slabs + live f32 acc + params.
    fused_bytes = (2 * (n_scale + 1) * feat_ch * HW * itemsize
                   + 3 * feat_ch * HW * 4
                   + 4 * (2 * n_scale * feat_ch * C4 + n_scale * feat_ch + C4 + n_scale))
    fused_budget = (capacity * 2) // 5                                 # ~40% of per-core VMEM

    if (not force_two_pass) and fused_bytes <= fused_budget:
        # ------- single-pass fused path: one HBM read per feature map ---------
        w1 = params["w1"].astype(jnp.float32).reshape(n_scale, feat_ch, C4)
        b1 = params["b1"].astype(jnp.float32).reshape(1, C4)
        w2t = jnp.transpose(
            params["w2"].astype(jnp.float32).reshape(C4, n_scale, feat_ch),
            (1, 2, 0))                                                 # (S, fc, C4)
        b2 = params["b2"].astype(jnp.float32).reshape(n_scale, feat_ch, 1)
        sw3 = sw.reshape(n_scale, 1, 1)

        feat_spec = pl.BlockSpec((None, feat_ch, HW), lambda b: (b, 0, 0))
        vmem_limit = int(min(capacity * 9 // 10,
                             max(32 * 1024 * 1024, fused_bytes * 5 // 4)))
        cost = pl.CostEstimate(
            flops=2 * (n_scale + 1) * B * feat_ch * HW,
            transcendentals=B * (C + C4),
            bytes_accessed=(n_scale + 1) * B * feat_ch * HW * itemsize)

        out_flat = pl.pallas_call(
            _make_fused_kernel(n_scale),
            out_shape=jax.ShapeDtypeStruct((B, feat_ch, HW), out_dtype),
            grid=(B,),
            in_specs=[
                pl.BlockSpec((n_scale, feat_ch, C4), lambda b: (0, 0, 0)),  # w1
                pl.BlockSpec((1, C4), lambda b: (0, 0)),                    # b1
                pl.BlockSpec((n_scale, feat_ch, C4), lambda b: (0, 0, 0)),  # w2t
                pl.BlockSpec((n_scale, feat_ch, 1), lambda b: (0, 0, 0)),   # b2
                pl.BlockSpec((n_scale, 1, 1), lambda b: (0, 0, 0)),         # softmax(scale_w)
            ] + [feat_spec] * n_scale,
            out_specs=pl.BlockSpec((None, feat_ch, HW), lambda b: (b, 0, 0)),
            compiler_params=pltpu.CompilerParams(
                dimension_semantics=("parallel",),
                vmem_limit_bytes=vmem_limit),
            cost_estimate=cost,
        )(w1, b1, w2t, b2, sw3, *feats_flat)
        return out_flat.reshape(B, feat_ch, H, W)

    # ------- two-pass fallback: GAP + SE-MLP in XLA, streaming FMA kernel ------
    pooled = jnp.concatenate(
        [jnp.mean(f.astype(jnp.float32), axis=(2, 3)) for f in feats], axis=1)  # (B, C)
    h = jax.nn.relu(pooled @ params["w1"].astype(jnp.float32)
                    + params["b1"].astype(jnp.float32))                          # (B, C4)
    att = jax.nn.sigmoid(h @ params["w2"].astype(jnp.float32)
                         + params["b2"].astype(jnp.float32))                     # (B, C)
    # Fold softmax(scale_w) into the attention vector (saves one full H*W*C pass).
    att_scaled = (att.reshape(B, n_scale, feat_ch) * sw[None, :, None]
                  ).reshape(B, n_scale, feat_ch, 1)

    tile_budget = min(24 * 1024 * 1024, capacity // 4)
    T = _pick_spatial_tile(HW, feat_ch, n_scale, itemsize, tile_budget, B)
    grid = (B, pl.cdiv(HW, T))

    per_step_bytes = ((n_scale + 1) * 2 * feat_ch * T * itemsize
                      + 2 * feat_ch * T * 4
                      + 4 * 2 * n_scale * feat_ch)
    vmem_limit = int(min(capacity * 9 // 10,
                         max(32 * 1024 * 1024, per_step_bytes * 3 // 2)))
    cost = pl.CostEstimate(
        flops=2 * n_scale * B * feat_ch * HW,
        transcendentals=0,
        bytes_accessed=(n_scale + 1) * B * feat_ch * HW * itemsize)

    att_spec = pl.BlockSpec((None, n_scale, feat_ch, 1), lambda b, t: (b, 0, 0, 0))
    feat_spec = pl.BlockSpec((None, feat_ch, T), lambda b, t: (b, 0, t))
    out_spec = pl.BlockSpec((None, feat_ch, T), lambda b, t: (b, 0, t))

    # Grid order: B outer, spatial inner — the att block index depends only on b,
    # so it stays VMEM-resident across the inner spatial sweep.
    out_flat = pl.pallas_call(
        _make_stream_kernel(n_scale),
        out_shape=jax.ShapeDtypeStruct((B, feat_ch, HW), out_dtype),
        grid=grid,
        in_specs=[att_spec] + [feat_spec] * n_scale,
        out_specs=out_spec,
        compiler_params=pltpu.CompilerParams(
            dimension_semantics=("parallel", "parallel"),
            vmem_limit_bytes=vmem_limit),
        cost_estimate=cost,
    )(att_scaled, *feats_flat)
    return out_flat.reshape(B, feat_ch, H, W)


def safusion_ref(feats, params):
    """Pure-JAX reference mirroring the PyTorch forward (NCHW)."""
    x = jnp.concatenate(feats, axis=1)                              # (B, C, H, W)
    pooled = jnp.mean(x, axis=(2, 3))                               # (B, C)
    h = jax.nn.relu(pooled @ params["w1"] + params["b1"])           # (B, C4)
    att = jax.nn.sigmoid(h @ params["w2"] + params["b2"])           # (B, C)
    x = x * att[:, :, None, None]
    B, C, H, W = x.shape
    n_scale = params["scale_w"].shape[0]
    feat_ch = C // n_scale
    x5 = x.reshape(B, n_scale, feat_ch, H, W)
    w = jax.nn.softmax(params["scale_w"]).reshape(1, n_scale, 1, 1, 1)
    return (x5 * w).sum(axis=1)


if __name__ == "__main__":
    n_scale, feat_ch = 2, 8
    B, H, W = 2, 16, 16
    C, C4 = feat_ch * n_scale, feat_ch // 4

    key = jax.random.PRNGKey(0)
    ks = jax.random.split(key, 7)
    feats = [
        jax.random.normal(ks[i], (B, feat_ch, H, W), jnp.float32)
        for i in range(n_scale)
    ]
    # Deterministic synthetic parameters (Conv2d 1x1 == dense on channels;
    # stored directly as (in, out) matmul matrices, scale-major channel order).
    params = {
        "w1": 0.1 * jax.random.normal(ks[2], (C, C4), jnp.float32),
        "b1": 0.1 * jax.random.normal(ks[3], (C4,), jnp.float32),
        "w2": 0.1 * jax.random.normal(ks[4], (C4, C), jnp.float32),
        "b2": 0.1 * jax.random.normal(ks[5], (C,), jnp.float32),
        # __init__ uses ones(n_scale); perturb slightly so softmax is non-trivial
        "scale_w": jnp.ones((n_scale,), jnp.float32)
        + 0.1 * jax.random.normal(ks[6], (n_scale,), jnp.float32),
    }

    ref = safusion_ref(feats, params)

    # Fused single-pass path (default for this shape).
    out_fused = jax.block_until_ready(safusion_forward(feats, params))
    assert out_fused.shape == (B, feat_ch, H, W), out_fused.shape
    assert jnp.allclose(out_fused, ref, rtol=1e-5, atol=1e-5), float(
        jnp.max(jnp.abs(out_fused - ref)))

    # Two-pass fallback path (used for large H*W slabs); exercised here for coverage.
    out_stream = jax.block_until_ready(
        safusion_forward(feats, params, force_two_pass=True))
    assert jnp.allclose(out_stream, ref, rtol=1e-5, atol=1e-5), float(
        jnp.max(jnp.abs(out_stream - ref)))

    print("KERNEL_OK")
</pallas_src>

<mosaic_0001>
module attributes {stable_mosaic.version = 11 : i64} {
  func.func @kernel(%arg0: i32, %arg1: memref<2x8x2xf32, #tpu.memory_space<vmem>>, %arg2: memref<1x2xf32, #tpu.memory_space<vmem>>, %arg3: memref<2x8x2xf32, #tpu.memory_space<vmem>>, %arg4: memref<2x8x1xf32, #tpu.memory_space<vmem>>, %arg5: memref<2x1x1xf32, #tpu.memory_space<vmem>>, %arg6: memref<1x8x256xf32, #tpu.memory_space<vmem>>, %arg7: memref<1x8x256xf32, #tpu.memory_space<vmem>>, %arg8: memref<1x8x256xf32, #tpu.memory_space<vmem>>) attributes {dimension_semantics = [#tpu.dimension_semantics<parallel>], iteration_bounds = array<i64: 2>, scalar_prefetch = 0 : i64, scratch_operands = 0 : i64, tpu.core_type = #tpu.core_type<tc>, window_params = [{pipeline_mode = #tpu.pipeline_mode<synchronous>, transform_indices = @transform_0, window_bounds = array<i64: 2, 8, 2>}, {pipeline_mode = #tpu.pipeline_mode<synchronous>, transform_indices = @transform_1, window_bounds = array<i64: 1, 2>}, {pipeline_mode = #tpu.pipeline_mode<synchronous>, transform_indices = @transform_2, window_bounds = array<i64: 2, 8, 2>}, {pipeline_mode = #tpu.pipeline_mode<synchronous>, transform_indices = @transform_3, window_bounds = array<i64: 2, 8, 1>}, {pipeline_mode = #tpu.pipeline_mode<synchronous>, transform_indices = @transform_4, window_bounds = array<i64: 2, 1, 1>}, {transform_indices = @transform_5, window_bounds = array<i64: 1, 8, 256>}, {transform_indices = @transform_6, window_bounds = array<i64: 1, 8, 256>}, {transform_indices = @transform_7, window_bounds = array<i64: 1, 8, 256>}]} {
    %c0 = arith.constant 0 : index
    %c0_0 = arith.constant 0 : index
    %0 = vector.load %arg2[%c0, %c0_0] : memref<1x2xf32, #tpu.memory_space<vmem>>, vector<1x2xf32>
    %c0_1 = arith.constant 0 : index
    %c0_2 = arith.constant 0 : index
    %c0_3 = arith.constant 0 : index
    %1 = vector.load %arg6[%c0_1, %c0_2, %c0_3] : memref<1x8x256xf32, #tpu.memory_space<vmem>>, vector<1x8x256xf32>
    %2 = vector.shape_cast %1 : vector<1x8x256xf32> to vector<8x256xf32>
    %cst = arith.constant dense<0.000000e+00> : vector<8xf32>
    %3 = vector.multi_reduction <add>, %2, %cst [1] : vector<8x256xf32> to vector<8xf32>
    %4 = vector.shape_cast %3 : vector<8xf32> to vector<8x1xf32>
    %cst_4 = arith.constant 2.560000e+02 : f32
    %5 = vector.broadcast %cst_4 : f32 to vector<8x1xf32>
    %6 = arith.divf %4, %5 : vector<8x1xf32>
    %c0_5 = arith.constant 0 : index
    %c0_6 = arith.constant 0 : index
    %c0_7 = arith.constant 0 : index
    %7 = vector.load %arg1[%c0_5, %c0_6, %c0_7] : memref<2x8x2xf32, #tpu.memory_space<vmem>>, vector<1x8x2xf32>
    %8 = vector.shape_cast %7 : vector<1x8x2xf32> to vector<8x2xf32>
    %9 = vector.broadcast %6 : vector<8x1xf32> to vector<8x2xf32>
    %10 = arith.mulf %8, %9 : vector<8x2xf32>
    %cst_8 = arith.constant dense<0.000000e+00> : vector<2xf32>
    %11 = vector.multi_reduction <add>, %10, %cst_8 [0] : vector<8x2xf32> to vector<2xf32>
    %12 = vector.shape_cast %11 : vector<2xf32> to vector<1x2xf32>
    %13 = arith.addf %0, %12 : vector<1x2xf32>
    %c0_9 = arith.constant 0 : index
    %c0_10 = arith.constant 0 : index
    %c0_11 = arith.constant 0 : index
    %14 = vector.load %arg7[%c0_9, %c0_10, %c0_11] : memref<1x8x256xf32, #tpu.memory_space<vmem>>, vector<1x8x256xf32>
    %15 = vector.shape_cast %14 : vector<1x8x256xf32> to vector<8x256xf32>
    %cst_12 = arith.constant dense<0.000000e+00> : vector<8xf32>
    %16 = vector.multi_reduction <add>, %15, %cst_12 [1] : vector<8x256xf32> to vector<8xf32>
    %17 = vector.shape_cast %16 : vector<8xf32> to vector<8x1xf32>
    %cst_13 = arith.constant 2.560000e+02 : f32
    %18 = vector.broadcast %cst_13 : f32 to vector<8x1xf32>
    %19 = arith.divf %17, %18 : vector<8x1xf32>
    %c1 = arith.constant 1 : index
    %c0_14 = arith.constant 0 : index
    %c0_15 = arith.constant 0 : index
    %20 = vector.load %arg1[%c1, %c0_14, %c0_15] : memref<2x8x2xf32, #tpu.memory_space<vmem>>, vector<1x8x2xf32>
    %21 = vector.shape_cast %20 : vector<1x8x2xf32> to vector<8x2xf32>
    %22 = vector.broadcast %19 : vector<8x1xf32> to vector<8x2xf32>
    %23 = arith.mulf %21, %22 : vector<8x2xf32>
    %cst_16 = arith.constant dense<0.000000e+00> : vector<2xf32>
    %24 = vector.multi_reduction <add>, %23, %cst_16 [0] : vector<8x2xf32> to vector<2xf32>
    %25 = vector.shape_cast %24 : vector<2xf32> to vector<1x2xf32>
    %26 = arith.addf %13, %25 : vector<1x2xf32>
    %cst_17 = arith.constant 0.000000e+00 : f32
    %27 = vector.broadcast %cst_17 : f32 to vector<1x2xf32>
    %28 = arith.maximumf %26, %27 : vector<1x2xf32>
    %c0_18 = arith.constant 0 : index
    %c0_19 = arith.constant 0 : index
    %c0_20 = arith.constant 0 : index
    %29 = vector.load %arg3[%c0_18, %c0_19, %c0_20] : memref<2x8x2xf32, #tpu.memory_space<vmem>>, vector<1x8x2xf32>
    %30 = vector.shape_cast %29 : vector<1x8x2xf32> to vector<8x2xf32>
    %31 = vector.broadcast %28 : vector<1x2xf32> to vector<8x2xf32>
    %32 = arith.mulf %30, %31 : vector<8x2xf32>
    %cst_21 = arith.constant dense<0.000000e+00> : vector<8xf32>
    %33 = vector.multi_reduction <add>, %32, %cst_21 [1] : vector<8x2xf32> to vector<8xf32>
    %34 = vector.shape_cast %33 : vector<8xf32> to vector<8x1xf32>
    %c0_22 = arith.constant 0 : index
    %c0_23 = arith.constant 0 : index
    %c0_24 = arith.constant 0 : index
    %35 = vector.load %arg4[%c0_22, %c0_23, %c0_24] : memref<2x8x1xf32, #tpu.memory_space<vmem>>, vector<1x8x1xf32>
    %36 = vector.shape_cast %35 : vector<1x8x1xf32> to vector<8x1xf32>
    %37 = arith.addf %34, %36 : vector<8x1xf32>
    %38 = arith.negf %37 : vector<8x1xf32>
    %39 = math.exp %38 : vector<8x1xf32>
    %cst_25 = arith.constant 1.000000e+00 : f32
    %40 = vector.broadcast %cst_25 : f32 to vector<8x1xf32>
    %41 = arith.addf %40, %39 : vector<8x1xf32>
    %42 = arith.divf %40, %41 : vector<8x1xf32>
    %c0_26 = arith.constant 0 : index
    %c0_27 = arith.constant 0 : index
    %c0_28 = arith.constant 0 : index
    %43 = vector.load %arg5[%c0_26, %c0_27, %c0_28] : memref<2x1x1xf32, #tpu.memory_space<vmem>>, vector<1x1x1xf32>
    %44 = vector.shape_cast %43 : vector<1x1x1xf32> to vector<1x1xf32>
    %45 = vector.broadcast %44 : vector<1x1xf32> to vector<8x1xf32>
    %46 = arith.mulf %42, %45 : vector<8x1xf32>
    %c0_29 = arith.constant 0 : index
    %c0_30 = arith.constant 0 : index
    %c0_31 = arith.constant 0 : index
    %47 = vector.load %arg6[%c0_29, %c0_30, %c0_31] : memref<1x8x256xf32, #tpu.memory_space<vmem>>, vector<1x8x256xf32>
    %48 = vector.shape_cast %47 : vector<1x8x256xf32> to vector<8x256xf32>
    %49 = vector.broadcast %46 : vector<8x1xf32> to vector<8x256xf32>
    %50 = arith.mulf %48, %49 : vector<8x256xf32>
    %c1_32 = arith.constant 1 : index
    %c0_33 = arith.constant 0 : index
    %c0_34 = arith.constant 0 : index
    %51 = vector.load %arg3[%c1_32, %c0_33, %c0_34] : memref<2x8x2xf32, #tpu.memory_space<vmem>>, vector<1x8x2xf32>
    %52 = vector.shape_cast %51 : vector<1x8x2xf32> to vector<8x2xf32>
    %53 = vector.broadcast %28 : vector<1x2xf32> to vector<8x2xf32>
    %54 = arith.mulf %52, %53 : vector<8x2xf32>
    %cst_35 = arith.constant dense<0.000000e+00> : vector<8xf32>
    %55 = vector.multi_reduction <add>, %54, %cst_35 [1] : vector<8x2xf32> to vector<8xf32>
    %56 = vector.shape_cast %55 : vector<8xf32> to vector<8x1xf32>
    %c1_36 = arith.constant 1 : index
    %c0_37 = arith.constant 0 : index
    %c0_38 = arith.constant 0 : index
    %57 = vector.load %arg4[%c1_36, %c0_37, %c0_38] : memref<2x8x1xf32, #tpu.memory_space<vmem>>, vector<1x8x1xf32>
    %58 = vector.shape_cast %57 : vector<1x8x1xf32> to vector<8x1xf32>
    %59 = arith.addf %56, %58 : vector<8x1xf32>
    %60 = arith.negf %59 : vector<8x1xf32>
    %61 = math.exp %60 : vector<8x1xf32>
    %cst_39 = arith.constant 1.000000e+00 : f32
    %62 = vector.broadcast %cst_39 : f32 to vector<8x1xf32>
    %63 = arith.addf %62, %61 : vector<8x1xf32>
    %64 = arith.divf %62, %63 : vector<8x1xf32>
    %c1_40 = arith.constant 1 : index
    %c0_41 = arith.constant 0 : index
    %c0_42 = arith.constant 0 : index
    %65 = vector.load %arg5[%c1_40, %c0_41, %c0_42] : memref<2x1x1xf32, #tpu.memory_space<vmem>>, vector<1x1x1xf32>
    %66 = vector.shape_cast %65 : vector<1x1x1xf32> to vector<1x1xf32>
    %67 = vector.broadcast %66 : vector<1x1xf32> to vector<8x1xf32>
    %68 = arith.mulf %64, %67 : vector<8x1xf32>
    %c0_43 = arith.constant 0 : index
    %c0_44 = arith.constant 0 : index
    %c0_45 = arith.constant 0 : index
    %69 = vector.load %arg7[%c0_43, %c0_44, %c0_45] : memref<1x8x256xf32, #tpu.memory_space<vmem>>, vector<1x8x256xf32>
    %70 = vector.shape_cast %69 : vector<1x8x256xf32> to vector<8x256xf32>
    %71 = vector.broadcast %68 : vector<8x1xf32> to vector<8x256xf32>
    %72 = arith.mulf %70, %71 : vector<8x256xf32>
    %73 = arith.addf %50, %72 : vector<8x256xf32>
    %c0_46 = arith.constant 0 : index
    %c0_47 = arith.constant 0 : index
    %c0_48 = arith.constant 0 : index
    %74 = vector.load %arg8[%c0_46, %c0_47, %c0_48] : memref<1x8x256xf32, #tpu.memory_space<vmem>>, vector<1x8x256xf32>
    %75 = vector.shape_cast %74 : vector<1x8x256xf32> to vector<8x256xf32>
    %76 = vector.shape_cast %73 : vector<8x256xf32> to vector<1x8x256xf32>
    tpu.vector_store %arg8[%c0_46, %c0_47, %c0_48], %76 {strides = array<i32>} : memref<1x8x256xf32, #tpu.memory_space<vmem>>, vector<1x8x256xf32>,
    return
  }
  func.func @transform_0(%arg0: i32) -> (i32, i32, i32) {
    %c0_i32 = arith.constant 0 : i32
    %c0_i32_0 = arith.constant 0 : i32
    %c0_i32_1 = arith.constant 0 : i32
    %c0_i32_2 = arith.constant 0 : i32
    return %c0_i32, %c0_i32_0, %c0_i32_1 : i32, i32, i32
  }
  func.func @transform_1(%arg0: i32) -> (i32, i32) {
    %c0_i32 = arith.constant 0 : i32
    %c0_i32_0 = arith.constant 0 : i32
    %c0_i32_1 = arith.constant 0 : i32
    return %c0_i32, %c0_i32_0 : i32, i32
  }
  func.func @transform_2(%arg0: i32) -> (i32, i32, i32) {
    %c0_i32 = arith.constant 0 : i32
    %c0_i32_0 = arith.constant 0 : i32
    %c0_i32_1 = arith.constant 0 : i32
    %c0_i32_2 = arith.constant 0 : i32
    return %c0_i32, %c0_i32_0, %c0_i32_1 : i32, i32, i32
  }
  func.func @transform_3(%arg0: i32) -> (i32, i32, i32) {
    %c0_i32 = arith.constant 0 : i32
    %c0_i32_0 = arith.constant 0 : i32
    %c0_i32_1 = arith.constant 0 : i32
    %c0_i32_2 = arith.constant 0 : i32
    return %c0_i32, %c0_i32_0, %c0_i32_1 : i32, i32, i32
  }
  func.func @transform_4(%arg0: i32) -> (i32, i32, i32) {
    %c0_i32 = arith.constant 0 : i32
    %c0_i32_0 = arith.constant 0 : i32
    %c0_i32_1 = arith.constant 0 : i32
    %c0_i32_2 = arith.constant 0 : i32
    return %c0_i32, %c0_i32_0, %c0_i32_1 : i32, i32, i32
  }
  func.func @transform_5(%arg0: i32) -> (i32, i32, i32) {
    %c0_i32 = arith.constant 0 : i32
    %c0_i32_0 = arith.constant 0 : i32
    %c0_i32_1 = arith.constant 0 : i32
    return %arg0, %c0_i32, %c0_i32_0 : i32, i32, i32
  }
  func.func @transform_6(%arg0: i32) -> (i32, i32, i32) {
    %c0_i32 = arith.constant 0 : i32
    %c0_i32_0 = arith.constant 0 : i32
    %c0_i32_1 = arith.constant 0 : i32
    return %arg0, %c0_i32, %c0_i32_0 : i32, i32, i32
  }
  func.func @transform_7(%arg0: i32) -> (i32, i32, i32) {
    %c0_i32 = arith.constant 0 : i32
    %c0_i32_0 = arith.constant 0 : i32
    %c0_i32_1 = arith.constant 0 : i32
    return %arg0, %c0_i32, %c0_i32_0 : i32, i32, i32
  }
}

</mosaic_0001>

<bundles_post_ra>
// kernel: tpu_custom_call.1
= control target key start
LH: loop header
LB: loop body
LE: loop exit
PB: predicated region body
PF: predicated region fallthrough
CT: control target
= control target key end

     0   :  { %12 = vsyncpa [#allocation3], 0  ;;  %s820_s0 = inlined_call_operand.vmem [shape: f32[2,8,2], index: 0, kind: input, shape index: {}]   ;;  %s821_s1 = inlined_call_operand.vmem [shape: f32[1,2], index: 1, kind: input, shape index: {}]   ;;  %s822_s2 = inlined_call_operand.vmem [shape: f32[2,8,2], index: 2, kind: input, shape index: {}]   ;;  %s823_s3 = inlined_call_operand.vmem [shape: f32[2,8,1], index: 3, kind: input, shape index: {}]   ;;  %s824_s4 = inlined_call_operand.vmem [shape: f32[2,1,1], index: 4, kind: input, shape index: {}]   ;;  %s825_s5 = inlined_call_operand.vmem [shape: f32[2,8,256], index: 5, kind: input, shape index: {}]   ;;  %s826_s6 = inlined_call_operand.vmem [shape: f32[2,8,256], index: 6, kind: input, shape index: {}]   ;;  %s827_s7 = inlined_call_operand.hbm [shape: f32[2,8,256], index: 7, kind: output, shape index: {}]  }
   0x1   :  { %14 = vsyncpa [#allocation3 + $0x1], 0  ;;  %s670_s24 = smov 0   ;;  %s672_s25 = smov 0  }
   0x2   :  { %s674_s26 = smov 0   ;;  %s676_s27 = smov 0  }
   0x3 LB: > { %s691_s28 = sadd.s32 4294967295, %s626_s27   ;;  %s489_s29 = sadd.s32 4294967294, %s626_s27   ;;  %s626_s27 = sphi %s676_s27, %s833_s27   ;;  %s622_s26 = sphi %s674_s26, %s832_s26   ;;  %s618_s25 = sphi %s672_s25, %s831_s25   ;;  %s614_s24 = sphi %s670_s24, %s830_s24  }
   0x4   : > { %s695_s30 = sadd.s32 1, %s626_s27   ;;  %s184_s8 = sadd.s32 1, %s622_s26 }
   0x5   : > { %s181_s9 = ssub.s32 %s626_s27, %s695_s30  ;;  %p194_p0 = scmp.ne.s32.totalorder %s622_s26, %s618_s25 }
   0x6   : > { %p182_p1 = scmp.eq.s32.totalorder %s181_s9, 0  ;;  %p195_p2 = scmp.eq.s32.totalorder %s691_s28, 1 }
   0x7   : > { %p200_p3 = scmp.ne.s32.totalorder %s618_s25, %s614_s24  ;;  %p201_p4 = scmp.eq.s32.totalorder %s489_s29, 1 }
   0x8   : > { %s706_s10 = scalar_select %p182_p1, %s622_s26, %s184_s8  }
   0x9   : > { %p708_p5 = por %p195_p2, %p194_p0  ;;  %p712_p6 = por %p201_p4, %p200_p3 }
   0xa   : > { %p492_p7 = scmp.ge.s32.totalorder %s626_s27, 1  ;;  %p250_p8 = scmp.lt.s32.totalorder %s626_s27, 3 }
   0xc   : > { %p251_p9 = pnand %p492_p7, %p250_p8 }
   0xd   : > { %p287_p10 = scmp.lt.s32.totalorder (!%p251_p9), %s691_s28, 1  ;;  %v305_v6 = vld [vmem:[%s820_s0] sm:$0xff] (!%p251_p9)  ;;  %vm307_vm0 = vcmask (!%p251_p9), 15360   ;;  %v498_v10 = vld [vmem:[%s820_s0 + $0x8] sm:$0xff] (!%p251_p9)  ;;  %v336_v24 = vlaneseq (!%p251_p9)  ;;  %v628_v42 = vmov (!%p251_p9), 0   ;;  %s284_s8 = sand.u32 (!%p251_p9), 1, %s618_s25  }
   0xe   : > { %254 = sbr.rel (%p251_p9) target bundleno = 522 (0x20a), region = 48  ;;  %v297_v27 = vld [vmem:[%s821_s1] sm:$0x1] (!%p251_p9)  ;;  %v501_v37 = vld [vmem:[%s822_s2 + $0x8] sm:$0xff] (!%p251_p9)  ;;  %554 = vset.pattern.permute.xlu0 (!%p251_p9), %v628_v42  ;;  %555 = vset.pattern.permute.xlu1 (!%p251_p9), %v628_v42  ;;  %v505_v58 = vld [vmem:[%s824_s4 + $0x1] ss:$0 sm:$0xff] (!%p251_p9) }
   0xf   : > { %v337_v29 = vshrl.u32 (!%p251_p9), %v336_v24, 7  ;;  %v334_v35 = vld [vmem:[%s822_s2] sm:$0xff] (!%p251_p9)  ;;  %v502_v46 = vld [vmem:[%s823_s3 + $0x8] sm:$0xff] (!%p251_p9)  ;;  %s493_s9 = sshll.u32 (!%p251_p9), %s284_s8, 4 }
  0x10   : > { %v345_v43 = vld [vmem:[%s823_s3] sm:$0xff] (!%p251_p9) }
  0x11   : > { %v338_v33 = vsub.s32 (!%p251_p9), 0, %v337_v29  ;;  %v500_v55 = vld [vmem:[%s824_s4] ss:$0 sm:$0xff] (!%p251_p9) }
  0x15   : > { %s288_s13 = scalar_select %p287_p10, %s691_s28, 1 }
  0x17   : > { %s511_s14 = sshll.u32 %s288_s13, 4  ;;  %s513_s13 = sshll.u32 %s691_s28, 8 }
  0x18   : > { %s291_s17 = scalar_lea.vmem %s825_s5, %s511_s14  ;;  %s296_s20 = scalar_lea.vmem %s826_s6, %s511_s14 }
  0x19   : > { %v726_v0 = vld [vmem:[%s291_s17] sm:$0xff]  ;;  %v728_v1 = vld [vmem:[%s291_s17 + $0x8] sm:$0xff]  ;;  %s286_s14 = scalar_lea.vmem [#allocation2], %s493_s9  ;;  %s778_s18 = scalar_lea.hbm %s827_s7, %s513_s13 }
  0x1a   : > { %v730_v2 = vld [vmem:[%s296_s20] sm:$0xff]  ;;  %v300_v3 = vadd.f32 %v728_v1, %v726_v0  ;;  %v734_v4 = vld [vmem:[%s296_s20 + $0x8] sm:$0xff]  ;;  %s418_s15 = sshll.u32 %s286_s14, 4  ;;  %s404_s28 = scalar_lea.sflag [#allocation3], %s284_s8  ;;  %s780_s15 = int_to_ptr.vmem [resolvable:$true] %s418_s15 }
  0x1b   : > { %v318_v5 = vadd.f32 %v734_v4, %v730_v2  ;;  %s564_s19 = scalar_lea.vmem %s780_s15, 256  ;;  %s629_s20 = smov [#allocation2]  }
  0x1c   : > { %301 = vadd.xlane.f32.xlu0 %v300_v3  ;;  %p565_p11 = scmp.ne.s32.totalorder %s780_s15, %s564_s19  ;;  %s568_s21 = sshll.u32 %s629_s20, 4  ;;  %s569_s21 = int_to_ptr.vmem [resolvable:$false] %s568_s21 }
  0x1d   : > { %s570_s22 = scalar_lea.vmem %s569_s21, 512  ;;  %p571_p0 = scmp.lt.s32.totalorder %s780_s15, %s569_s21 }
  0x1e   : > { %p566_p12 = pnand %p565_p11, %p708_p5  ;;  %p572_p1 = scmp.lt.s32.totalorder %s570_s22, %s564_s19 }
  0x20   : > { %319 = vadd.xlane.f32.xlu0 %v318_v5  ;;  %p567_p13 = pneg %p566_p12  ;;  %p573_p2 = por %p572_p1, %p571_p0 }
  0x22   : > { %p574_p3 = pnand %p573_p2, %p567_p13 }
  0xa9   : > { %v302_v7 = vpop.xlane.xlu0 %301 }
  0xaa   : > { %v304_v8 = vmul.f32 0.00390625, %v302_v7 }
  0xac   : > { %v306_v9 = vmul.f32 %v305_v6, %v304_v8 }
  0xad   : > { %v320_v11 = vpop.xlane.xlu0 %319 }
  0xae   : > { %v321_v12 = vmul.f32 0.00390625, %v320_v11  ;;  %v308_v13 = vsel %vm307_vm0, %v306_v9, 0.0 }
  0xaf   : > { %v309_v14 = vrot.slane %v308_v13, 4 }
  0xb0   : > { %v324_v15 = vmul.f32 %v498_v10, %v321_v12 }
  0xb1   : > { %v310_v16 = vadd.f32 %v309_v14, %v308_v13 }
  0xb2   : > { %v325_v17 = vsel %vm307_vm0, %v324_v15, 0.0 }
  0xb3   : > { %v311_v18 = vrot.slane %v310_v16, 2  ;;  %v326_v19 = vrot.slane %v325_v17, 4 }
  0xb5   : > { %v312_v20 = vadd.f32 %v311_v18, %v310_v16  ;;  %v327_v21 = vadd.f32 %v326_v19, %v325_v17 }
  0xb7   : > { %v313_v22 = vrot.slane %v312_v20, 1  ;;  %v328_v23 = vrot.slane %v327_v21, 2 }
  0xb9   : > { %v314_v25 = vadd.f32 %v313_v22, %v312_v20  ;;  %v329_v26 = vadd.f32 %v328_v23, %v327_v21 }
  0xbb   : > { %v330_v28 = vrot.slane %v329_v26, 1  ;;  %v315_v30 = vadd.f32 %v314_v25, %v297_v27 }
  0xbd   : > { %v331_v31 = vadd.f32 %v330_v28, %v329_v26 }
  0xbf   : > { %v332_v32 = vadd.f32 %v331_v31, %v315_v30 }
  0xc1   : > { %v333_v34 = vmax.f32 %v332_v32, 0.0 }
  0xc3   : > { %v339_v36 = vrot.slane %v333_v34, %v338_v33 }
  0xc5   : > { %v341_v38 = vmul.f32 %v339_v36, %v334_v35  ;;  %v370_v40 = vmul.f32 %v501_v37, %v339_v36 }
  0xc7   : > { %v342_v39 = vsel %vm307_vm0, %v341_v38, 0.0  ;;  %v371_v41 = vsel %vm307_vm0, %v370_v40, 0.0 }
  0xc8   : > { %343 = vadd.xlane.f32.xlu1 %v342_v39 }
  0xcc   : > { %372 = vadd.xlane.f32.xlu1 %v371_v41 }
 0x155   : > { %v344_v44 = vpop.xlane.xlu1 %343 }
 0x156   : > { %v346_v45 = vadd.f32 %v345_v43, %v344_v44 }
 0x158   : > { %v499_v47 = vmul.f32 -1.442695, %v346_v45 }
 0x159   : > { %v373_v48 = vpop.xlane.xlu1 %372 }
 0x15a   : > { %556 = vpow2.f32 %v499_v47  ;;  %v376_v49 = vadd.f32 %v502_v46, %v373_v48 }
 0x15c   : > { %v503_v50 = vmul.f32 -1.442695, %v376_v49 }
 0x15e   : > { %558 = vpow2.f32 %v503_v50 }
 0x164   : > { %v557_v51 = vpop.eup %556 }
 0x165   : > { %v350_v52 = vadd.f32 1.0, %v557_v51 }
 0x167   : > { %560 = vrcp.f32 %v350_v52 }
 0x168   : > { %v559_v53 = vpop.eup %558 }
 0x169   : > { %v380_v54 = vadd.f32 1.0, %v559_v53 }
 0x16b   : > { %562 = vrcp.f32 %v380_v54 }
 0x171   : > { %v561_v56 = vpop.eup %560 }
 0x172   : > { %v360_v57 = vmul.f32 %v561_v56, %v500_v55 }
 0x174   : > { %363 = vperm.xlu0 %554, %v360_v57  }
 0x175   : > { %v563_v59 = vpop.eup %562 }
 0x176   : > { %v391_v60 = vmul.f32 %v563_v59, %v505_v58 }
 0x178   : > { %394 = vperm.xlu1 %555, %v391_v60  }
 0x1f3   : > { %v364_v61 = vpop.permute.xlu0 %363 }
 0x1f4   : > { %v366_v63 = vmul.f32 %v364_v61, %v726_v0  ;;  %v367_v3 = vmul.f32 %v364_v61, %v728_v1 }
 0x1f7   : > { %v395_v62 = vpop.permute.xlu1 %394 }
 0x1f8   : > { %v397_v5 = vmul.f32 %v395_v62, %v730_v2  ;;  %v398_v6 = vmul.f32 %v395_v62, %v734_v4 }
 0x1fa   : > { %v399_v7 = vadd.f32 %v397_v5, %v366_v63  ;;  %v400_v8 = vadd.f32 %v398_v6, %v367_v3 }
 0x1fc   : > { %401 = vst [vmem:[%s286_s14] sm:$0xff] %v399_v7  ;;  %402 = vst [vmem:[%s286_s14 + $0x8] sm:$0xff] %v400_v8 }
 0x1fd   : > { %577 = shalt.err (!%p574_p3)
}
 0x1fe   : > { %s578_s23 = scalar_lea.hbm %s778_s18, 256  ;;  %s582_s9 = scalar_lea.hbm %s827_s7, 512 }
 0x1ff   : > { %p579_p4 = scmp.ne.s32.totalorder %s778_s18, %s578_s23  ;;  %p583_p9 = scmp.lt.u32.totalorder %s778_s18, %s827_s7 }
 0x200   : > { %p584_p10 = scmp.lt.u32.totalorder %s582_s9, %s578_s23  ;;  %p586_p12 = scmp.lt.u32.totalorder %s578_s23, %s778_s18 }
 0x201   : > { %p580_p7 = pnand %p579_p4, %p708_p5 }
 0x202   : > { %p585_p11 = por %p584_p10, %p583_p9 }
 0x203   : > { %p581_p8 = pneg %p580_p7 }
 0x204   : > { %p587_p13 = por %p586_p12, %p585_p11 }
 0x206   : > { %p588_p0 = pnand %p587_p13, %p581_p8 }
 0x208   : > { %591 = shalt.err (!%p588_p0)
}
 0x209   : > { %514 = dma.vmem_to_hbm [thread:$0]  (%p708_p5), %s780_s15, 256, %s778_s18, %s404_s28  }
 0x20a PF: > { %p520_p1 = scmp.ge.s32.totalorder %s626_s27, 2  ;;  %s430_s16 = sand.u32 1, %s614_s24  }
 0x20b   : > { %s431_s17 = scalar_lea.sflag [#allocation3], %s430_s16 }
 0x20c   : > { %p517_p2 = pnand %p520_p1, %p712_p6 }
 0x20e   : > { %609 = dma.done.wait (!%p517_p2), %s431_s17, 256  }
 0x20f   : > { %611 = vsyncadd (!%p517_p2), %s431_s17, 4294967040  ;;  %p17_p3 = scmp.ge.s32.totalorder %s695_s30, 4   ;;  %s830_s24 = smov %s618_s25 }
 0x210   : > { %s831_s25 = smov %s622_s26  ;;  %s832_s26 = smov %s706_s10 }
 0x211   : > { %s833_s27 = smov %s695_s30  ;;  %19 = sbr.rel (!%p17_p3) target bundleno = 3 (0x3), region = 90 }
 0x218   :  { %436 = vsyncpa [#allocation3], 1 }
 0x219   :  { %438 = vsyncpa [#allocation3 + $0x1], 1 }

</bundles_post_ra>
